<compile_context>
chip_gen: v7x
topology: tpu7x:2x2x1
jax: 0.10.0
libtpu: 0.0.40
codegen_flags: <defaults>
</compile_context>

<pallas_src>
import functools

import jax
import jax.numpy as jnp
import numpy as np
from jax.experimental import pallas as pl
from jax.experimental.pallas import tpu as pltpu

EPS = 1e-5
GROUPS = 32

# ---------------------------------------------------------------------------
# One-off probes (cached): pltpu.roll sign convention + bf16-rotate support,
# and pl.Buffered(1) (single-buffered invariant operands) support.
# ---------------------------------------------------------------------------
_ROLL_CFG = None          # (roll_sign, bf16_roll_ok)
_SINGLE_BUF_OK = None
_KERNEL_CFG = None        # (roll_sign, stage_bf16, single_buffer) after 1st call


def _roll_probe_kernel(x_ref, o_ref):
    o_ref[...] = pltpu.roll(x_ref[...], 1, 0)


def _probe_roll():
    """Pin down pltpu.roll's sign convention and packed-bf16 rotate support."""
    global _ROLL_CFG
    if _ROLL_CFG is not None:
        return _ROLL_CFG

    def run(dtype):
        x = jnp.zeros((32, 128), jnp.float32).at[1, 0].set(1.0).astype(dtype)
        y = pl.pallas_call(
            _roll_probe_kernel,
            out_shape=jax.ShapeDtypeStruct((32, 128), dtype),
        )(x)
        y = np.asarray(jax.block_until_ready(y)).astype(np.float32)
        if y[2, 0] > 0.5:          # matches jnp.roll(x, +1, axis=0)
            return 1
        if y[0, 0] > 0.5:          # opposite convention
            return -1
        return 0                   # unexpected -> treat as unsupported

    bf16_ok = False
    sign = 0
    try:
        sign = run(jnp.bfloat16)
        bf16_ok = sign != 0
    except Exception:
        bf16_ok = False
    if not bf16_ok:
        sign = run(jnp.float32)
        if sign == 0:
            sign = 1               # default to the jnp.roll convention
    _ROLL_CFG = (sign, bf16_ok)
    return _ROLL_CFG


def _single_buf_probe_kernel(x_ref, o_ref):
    o_ref[...] = x_ref[...] + 1.0


def _probe_single_buffer():
    """Check pipeline_mode=pl.Buffered(1) for grid-invariant inputs."""
    global _SINGLE_BUF_OK
    if _SINGLE_BUF_OK is not None:
        return _SINGLE_BUF_OK
    try:
        spec = pl.BlockSpec((8, 128), lambda i: (0, 0),
                            pipeline_mode=pl.Buffered(buffer_count=1))
        y = pl.pallas_call(
            _single_buf_probe_kernel,
            grid=(2,),
            in_specs=[spec],
            out_specs=pl.BlockSpec((8, 128), lambda i: (0, 0)),
            out_shape=jax.ShapeDtypeStruct((8, 128), jnp.float32),
        )(jnp.zeros((8, 128), jnp.float32))
        jax.block_until_ready(y)
        _SINGLE_BUF_OK = True
    except Exception:
        _SINGLE_BUF_OK = False
    return _SINGLE_BUF_OK


# ---------------------------------------------------------------------------
# In-kernel helpers
# ---------------------------------------------------------------------------
def _silu(v):
    # Exact sigmoid: exp + divide both run on the EUP, which has slack in the
    # MXU-bound regime (the approximate reciprocal was not worth its error).
    return v / (1.0 + jnp.exp(-v))


def _group_norm(h2d, gamma, beta, gsel_ref, gscat_ref, groups):
    """GroupNorm of a [HW, C] tile (stats over HW x channels-per-group)."""
    HW, C = h2d.shape
    cg = C // groups
    inv_n = 1.0 / float(cg * HW)

    def group_bcast(v):  # [1, C] per-channel sums -> per-channel group sums
        if cg == 1:      # GroupNorm(32, 32): one channel per group
            return v
        # contiguous-group one-hots are precomputed in the wrapper (no
        # per-step iota/compare/cast work); tiny f32 matmuls keep stats exact.
        g = jnp.dot(v, gsel_ref[...], preferred_element_type=jnp.float32)
        return jnp.dot(g, gscat_ref[...], preferred_element_type=jnp.float32)

    s = jnp.sum(h2d, axis=0, keepdims=True)                  # [1, C]
    mean = group_bcast(s) * inv_n
    d = h2d - mean                                            # two-pass variance
    ss = jnp.sum(d * d, axis=0, keepdims=True)
    var = group_bcast(ss) * inv_n
    return d * jax.lax.rsqrt(var + EPS) * gamma + beta


def _conv3x3(h2d, pad_ref, w_ref, bias, mask_l, mask_r, H, W, roll_sign):
    """3x3 / stride-1 / pad-1 conv of an [HW, Cin] tile -> [HW, Cout] f32.

    The activation is cast once to pad_ref.dtype (normally bf16) and staged
    into an H-only-padded, W-flattened buffer; dy taps are aligned leading
    offset slices, dx = +/-1 taps are single-step sublane rotations (XLU)
    gated by a 0/1 edge select, and each of the 9 taps is one bf16 MXU matmul
    accumulated in f32.  Only one shifted buffer is live at a time.
    """
    HW, Cin = h2d.shape
    Co = w_ref.shape[3]
    RW = (H + 2) * W

    # One zero image-row above and below; the interior is fully rewritten each
    # step, so this is all the zero filling that is needed.
    zrow = jnp.zeros((W, Cin), pad_ref.dtype)
    pad_ref[0:W, :] = zrow
    pad_ref[RW - W:RW, :] = zrow
    pad_ref[W:RW - W, :] = h2d.astype(pad_ref.dtype)     # single downcast pass

    fv = pad_ref[...]                                     # [(H+2)*W, Cin]
    acc = jnp.zeros((HW, Co), jnp.float32)
    for dx in (-1, 0, 1):
        if dx == 0:
            sh = fv
        else:
            # sh[i] == fv[i + dx]; the wrap-around element lands on a zero
            # border row or is removed by the edge select below.
            rolled = pltpu.roll(fv, (roll_sign * -dx) % RW, 0)
            mask = mask_l if dx == -1 else mask_r
            sh = jnp.where(mask, rolled, jnp.zeros_like(rolled))
        sh = sh.astype(jnp.bfloat16)   # no-op when staging is already bf16
        for ky in range(3):            # dy = ky - 1 handled by the H padding
            base = ky * W              # aligned leading-offset slice
            acc = acc + jnp.dot(sh[base:base + HW, :], w_ref[ky, dx + 1],
                                preferred_element_type=jnp.float32)
    return acc + bias


# ---------------------------------------------------------------------------
# Fused ResBlock kernel (one batch element per grid step)
# ---------------------------------------------------------------------------
def resblock_kernel(x_ref, embo_ref, wmask_ref, gsel_ref, gscat_ref,
                    g1_ref, be1_ref, w1_ref, b1_ref,
                    g2_ref, be2_ref, w2_ref, b2_ref,
                    o_ref,
                    pad1_ref, pad2_ref,
                    *, H, W, groups, roll_sign):
    x2d = x_ref[0]                                   # [HW, C] f32
    mask_l = wmask_ref[0] > 0.5                      # [(H+2)*W, 1] bool
    mask_r = wmask_ref[1] > 0.5

    # in_layers: GroupNorm(32, C) -> SiLU -> Conv2d(C, Co, 3, pad=1)
    h = _silu(_group_norm(x2d, g1_ref[...], be1_ref[...],
                          gsel_ref, gscat_ref, groups))
    h = _conv3x3(h, pad1_ref, w1_ref, b1_ref[...], mask_l, mask_r, H, W,
                 roll_sign)

    # emb_layers output (precomputed as one batched XLA GEMM in the wrapper)
    h = h + embo_ref[0]

    # out_layers: GroupNorm(32, Co) -> SiLU -> Dropout(eval) -> Conv2d(Co, Co, 3)
    h = _silu(_group_norm(h, g2_ref[...], be2_ref[...],
                          gsel_ref, gscat_ref, groups))
    h = _conv3x3(h, pad2_ref, w2_ref, b2_ref[...], mask_l, mask_r, H, W,
                 roll_sign)

    # skip_connection = Identity (out_channels == channels)
    o_ref[0] = (x2d + h).astype(o_ref.dtype)


# ---------------------------------------------------------------------------
# Wrapper
# ---------------------------------------------------------------------------
def _pick_vmem_limit(live_bytes):
    """Per-generation VMEM limit: enough for our buffers plus temporaries /
    compiler scratch headroom, never more than ~7/8 of physical VMEM."""
    try:
        cap = int(pltpu.get_tpu_info().vmem_capacity_bytes)
    except Exception:
        cap = 128 * 1024 * 1024            # v5e / v6e physical
    ceiling = (cap // 8) * 7
    want = int(live_bytes * 1.5) + (8 << 20)
    return int(max(32 << 20, min(ceiling, want)))


@functools.partial(jax.jit, static_argnames=("roll_sign", "stage_bf16",
                                              "single_buffer", "out_dtype"))
def _resblock_nhwc_impl(x, emb, params, *, roll_sign, stage_bf16,
                        single_buffer, out_dtype):
    N, H, W, C = x.shape
    E = emb.shape[1]
    Co = params["w1"].shape[3]
    assert Co == C, "this configuration has out_channels == channels"
    assert C % GROUPS == 0
    HW = H * W
    RW = (H + 2) * W
    cg = C // GROUPS
    stage_dtype = jnp.bfloat16 if stage_bf16 else jnp.float32

    # emb_layers hoisted out of the kernel: one batched GEMM for all N.
    emb_out = (jax.nn.silu(emb) @ params["we"] + params["bemb"]).reshape(N, 1, Co)

    # 0/1 validity masks for the dx = -1 / +1 taps (left / right image edge).
    col = np.arange(RW) % W
    wmask = jnp.asarray(
        np.stack([(col != 0), (col != W - 1)]).astype(np.float32)[:, :, None])

    # Contiguous-group one-hot matrices for the GroupNorm statistics
    # (hoisted out of the kernel; shared by both group norms since Co == C).
    gid = np.arange(C) // cg
    gsel_np = (gid[:, None] == np.arange(GROUPS)[None, :]).astype(np.float32)
    gsel = jnp.asarray(gsel_np)                 # [C, G]
    gscat = jnp.asarray(gsel_np.T.copy())       # [G, C]

    # bf16 conv weights (MXU-native, half the DMA / VMEM).
    w1 = params["w1"].astype(jnp.bfloat16)
    w2 = params["w2"].astype(jnp.bfloat16)

    x2 = x.reshape(N, HW, C)            # free reshape (merge of trailing dims)

    kernel = functools.partial(resblock_kernel, H=H, W=W, groups=GROUPS,
                               roll_sign=roll_sign)

    def rep(shape):                     # grid-invariant (replicated) operand
        index_map = lambda n: (0,) * len(shape)
        if single_buffer:
            # Block index never changes -> one buffer suffices; default
            # double-buffering would duplicate the largest VMEM consumers.
            return pl.BlockSpec(shape, index_map,
                                pipeline_mode=pl.Buffered(buffer_count=1))
        return pl.BlockSpec(shape, index_map)

    # Rough per-step VMEM footprint (drives the per-generation limit).
    osize = jnp.dtype(out_dtype).itemsize
    ssize = jnp.dtype(stage_dtype).itemsize
    nbuf_inv = 1 if single_buffer else 2
    live_bytes = (
        2 * HW * C * 4                        # x blocks (double-buffered)
        + 2 * HW * Co * osize                 # output blocks
        + 2 * Co * 4                          # emb blocks
        + nbuf_inv * (
            2 * RW * 128 * 4                  # edge masks (lane-padded)
            + 2 * C * GROUPS * 4              # GN one-hot matrices
            + 6 * max(C, Co) * 4              # gammas / betas / biases
            + 9 * (C * Co + Co * Co) * 2)     # bf16 conv weights
        + RW * (C + Co) * ssize               # padded staging scratch
        + RW * max(C, Co) * ssize             # one live shifted copy
        + 2 * HW * Co * 4                     # f32 accumulator + activation
    )

    cost = pl.CostEstimate(
        flops=int(2 * N * HW * 9 * (C * Co + Co * Co)),
        transcendentals=int(N * HW * (C + Co)),
        bytes_accessed=int(4 * N * HW * C + osize * N * HW * Co
                           + 2 * 9 * (C * Co + Co * Co)
                           + 4 * N * (E + Co)),
    )

    y2 = pl.pallas_call(
        kernel,
        grid=(N,),
        in_specs=[
            pl.BlockSpec((1, HW, C), lambda n: (n, 0, 0)),     # x
            pl.BlockSpec((1, 1, Co), lambda n: (n, 0, 0)),     # emb_out
            rep((2, RW, 1)),                                   # edge masks
            rep((C, GROUPS)), rep((GROUPS, C)),                # GN one-hots
            rep((1, C)), rep((1, C)),                          # GN1 gamma/beta
            rep((3, 3, C, Co)), rep((1, Co)),                  # conv1 w/b
            rep((1, Co)), rep((1, Co)),                        # GN2 gamma/beta
            rep((3, 3, Co, Co)), rep((1, Co)),                 # conv2 w/b
        ],
        out_specs=pl.BlockSpec((1, HW, Co), lambda n: (n, 0, 0)),
        out_shape=jax.ShapeDtypeStruct((N, HW, Co), out_dtype),
        scratch_shapes=[
            pltpu.VMEM((RW, C), stage_dtype),    # conv1 H-padded staging
            pltpu.VMEM((RW, Co), stage_dtype),   # conv2 H-padded staging
        ],
        compiler_params=pltpu.CompilerParams(
            # batch elements are independent; on v7x (2 TCs/chip) call this
            # with N >= 2 so both cores get work.
            dimension_semantics=("parallel",),
            vmem_limit_bytes=_pick_vmem_limit(live_bytes),
        ),
        cost_estimate=cost,
    )(x2, emb_out, wmask, gsel, gscat,
      params["g1"], params["be1"], w1, params["b1"],
      params["g2"], params["be2"], w2, params["b2"])

    return y2.reshape(N, H, W, Co)


def resblock_forward_nhwc(x_nhwc, emb, params, out_dtype=jnp.float32):
    """ResBlock forward; x_nhwc: [N, H, W, C], emb: [N, emb_channels]."""
    global _KERNEL_CFG
    if _KERNEL_CFG is None:
        roll_sign, bf16_roll_ok = _probe_roll()
        candidates = [(roll_sign, bf16_roll_ok, _probe_single_buffer())]
        if candidates[0][1:] != (False, False):
            # Conservative fallback: f32 staging, default double-buffering.
            candidates.append((roll_sign, False, False))
        last_err = None
        for cfg in candidates:
            try:
                y = _resblock_nhwc_impl(x_nhwc, emb, params,
                                        roll_sign=cfg[0], stage_bf16=cfg[1],
                                        single_buffer=cfg[2],
                                        out_dtype=out_dtype)
                jax.block_until_ready(y)
                _KERNEL_CFG = cfg
                return y
            except Exception as e:       # fall back to the proven config
                last_err = e
        raise last_err
    cfg = _KERNEL_CFG
    return _resblock_nhwc_impl(x_nhwc, emb, params,
                               roll_sign=cfg[0], stage_bf16=cfg[1],
                               single_buffer=cfg[2], out_dtype=out_dtype)


def resblock_forward(x_nchw, emb, params, out_dtype=jnp.float32):
    """PyTorch-layout convenience wrapper (NCHW in / NCHW out).

    Prefer resblock_forward_nhwc inside an NHWC model: these transposes cost
    two extra HBM passes of the activation.
    """
    x = jnp.transpose(x_nchw, (0, 2, 3, 1))
    y = resblock_forward_nhwc(x, emb, params, out_dtype=out_dtype)
    return jnp.transpose(y, (0, 3, 1, 2))


# ---------------------------------------------------------------------------
# Pure-JAX reference (f32)
# ---------------------------------------------------------------------------
def _groupnorm_ref(x_nhwc, gamma, beta, groups=GROUPS, eps=EPS):
    N, H, W, C = x_nhwc.shape
    xg = x_nhwc.reshape(N, H, W, groups, C // groups)
    mean = xg.mean(axis=(1, 2, 4), keepdims=True)
    var = xg.var(axis=(1, 2, 4), keepdims=True)
    xn = ((xg - mean) / jnp.sqrt(var + eps)).reshape(N, H, W, C)
    return xn * gamma + beta


def resblock_ref_nhwc(x, emb, p):
    dn = ("NHWC", "HWIO", "NHWC")
    h = jax.nn.silu(_groupnorm_ref(x, p["g1"][0], p["be1"][0]))
    h = jax.lax.conv_general_dilated(h, p["w1"], (1, 1), [(1, 1), (1, 1)],
                                     dimension_numbers=dn) + p["b1"][0]
    eo = jax.nn.silu(emb) @ p["we"] + p["bemb"][0]
    h = h + eo[:, None, None, :]
    h = jax.nn.silu(_groupnorm_ref(h, p["g2"][0], p["be2"][0]))
    h = jax.lax.conv_general_dilated(h, p["w2"], (1, 1), [(1, 1), (1, 1)],
                                     dimension_numbers=dn) + p["b2"][0]
    return x + h


# ---------------------------------------------------------------------------
# Parameter construction
# ---------------------------------------------------------------------------
def make_params(key, C, Co, E):
    k = jax.random.split(key, 10)
    return {
        # GroupNorm(32, C) affine (randomised so the test exercises it)
        "g1": 1.0 + 0.1 * jax.random.normal(k[0], (1, C), jnp.float32),
        "be1": 0.1 * jax.random.normal(k[1], (1, C), jnp.float32),
        # Conv2d(C, Co, 3, padding=1), stored HWIO
        "w1": 0.05 * jax.random.normal(k[2], (3, 3, C, Co), jnp.float32),
        "b1": 0.05 * jax.random.normal(k[3], (1, Co), jnp.float32),
        # Linear(emb_channels, Co), stored transposed as [E, Co]
        "we": 0.05 * jax.random.normal(k[4], (E, Co), jnp.float32),
        "bemb": 0.05 * jax.random.normal(k[5], (1, Co), jnp.float32),
        # GroupNorm(32, Co)
        "g2": 1.0 + 0.1 * jax.random.normal(k[6], (1, Co), jnp.float32),
        "be2": 0.1 * jax.random.normal(k[7], (1, Co), jnp.float32),
        # Conv2d(Co, Co, 3) -- zero_module() in torch; nonzero here so the
        # test actually checks this path.
        "w2": 0.05 * jax.random.normal(k[8], (3, 3, Co, Co), jnp.float32),
        "b2": 0.05 * jax.random.normal(k[9], (1, Co), jnp.float32),
    }


if __name__ == "__main__":
    key = jax.random.PRNGKey(0)
    kx, kemb, kp = jax.random.split(key, 3)

    # channels must be divisible by 32 (GroupNorm(32, .)); out_channels ==
    # channels.  N = 2 keeps both v7x TensorCores busy on the parallel axis.
    N, H, W, C = 2, 16, 16, 32
    E = 64
    Co = C

    x = jax.random.normal(kx, (N, H, W, C), jnp.float32)     # NHWC end-to-end
    emb = jax.random.normal(kemb, (N, E), jnp.float32)
    params = make_params(kp, C, Co, E)

    y = resblock_forward_nhwc(x, emb, params)
    y = jax.block_until_ready(y)

    y_ref = resblock_ref_nhwc(x, emb, params)
    # Intentional mixed precision: bf16 conv weights / activation taps on the
    # MXU (f32 accumulate) dominate the mismatch vs. the f32 reference.
    np.testing.assert_allclose(np.asarray(y), np.asarray(y_ref),
                               rtol=5e-2, atol=5e-2)
    print("KERNEL_OK")
</pallas_src>

<mosaic_0001>
module attributes {stable_mosaic.version = 11 : i64} {
  func.func @_roll_probe_kernel(%arg0: memref<32x128xbf16, #tpu.memory_space<vmem>>, %arg1: memref<32x128xbf16, #tpu.memory_space<vmem>>) attributes {dimension_semantics = [], scalar_prefetch = 0 : i64, scratch_operands = 0 : i64, tpu.core_type = #tpu.core_type<tc>} {
    %c0 = arith.constant 0 : index
    %c0_0 = arith.constant 0 : index
    %0 = vector.load %arg0[%c0, %c0_0] : memref<32x128xbf16, #tpu.memory_space<vmem>>, vector<32x128xbf16>
    %c1_i32 = arith.constant 1 : i32
    %1 = tpu.dynamic_rotate %0 by %c1_i32 dim 0 : vector<32x128xbf16>, i32 -> vector<32x128xbf16>
    %c0_1 = arith.constant 0 : index
    %c0_2 = arith.constant 0 : index
    %2 = vector.load %arg1[%c0_1, %c0_2] : memref<32x128xbf16, #tpu.memory_space<vmem>>, vector<32x128xbf16>
    tpu.vector_store %arg1[%c0_1, %c0_2], %1 {strides = array<i32>} : memref<32x128xbf16, #tpu.memory_space<vmem>>, vector<32x128xbf16>,
    return
  }
}

module attributes {stable_mosaic.version = 11 : i64} {
  func.func @_roll_probe_kernel(%arg0: memref<32x128xf32, #tpu.memory_space<vmem>>, %arg1: memref<32x128xf32, #tpu.memory_space<vmem>>) attributes {dimension_semantics = [], scalar_prefetch = 0 : i64, scratch_operands = 0 : i64, tpu.core_type = #tpu.core_type<tc>} {
    %c0 = arith.constant 0 : index
    %c0_0 = arith.constant 0 : index
    %0 = vector.load %arg0[%c0, %c0_0] : memref<32x128xf32, #tpu.memory_space<vmem>>, vector<32x128xf32>
    %c1_i32 = arith.constant 1 : i32
    %1 = tpu.dynamic_rotate %0 by %c1_i32 dim 0 : vector<32x128xf32>, i32 -> vector<32x128xf32>
    %c0_1 = arith.constant 0 : index
    %c0_2 = arith.constant 0 : index
    %2 = vector.load %arg1[%c0_1, %c0_2] : memref<32x128xf32, #tpu.memory_space<vmem>>, vector<32x128xf32>
    tpu.vector_store %arg1[%c0_1, %c0_2], %1 {strides = array<i32>} : memref<32x128xf32, #tpu.memory_space<vmem>>, vector<32x128xf32>,
    return
  }
}

</mosaic_0001>

<bundles_post_ra>
// kernel: tpu_custom_call.1
= control target key start
LH: loop header
LB: loop body
LE: loop exit
PB: predicated region body
PF: predicated region fallthrough
CT: control target
= control target key end

     0   :  { %6 = vsyncpa [#allocation3], 0  ;;  %s155_s0 = inlined_call_operand.hbm [shape: f32[32,128], index: 0, kind: input, shape index: {}]   ;;  %s156_s1 = inlined_call_operand.hbm [shape: f32[32,128], index: 1, kind: output, shape index: {}]  }
   0x1   :  { %7 = vsyncpa [#allocation4], 0  ;;  %s111_s6 = smov [#allocation2]   ;;  %s63_s10 = scalar_lea.hbm %s155_s0, 512 }
   0x2   :  { %s13_s7 = sshll.u32 %s111_s6, 4  ;;  %p64_p0 = scmp.ne.s32.totalorder %s155_s0, %s63_s10  ;;  %s14_s7 = int_to_ptr.vmem [resolvable:$true] %s13_s7 }
   0x3   :  { %p67_p1 = scmp.lt.u32.totalorder %s63_s10, %s155_s0 }
   0x5   :  { %p69_p2 = pnand %p67_p1, %p64_p0 }
   0x7   :  { %72 = shalt.err (!%p69_p2)
}
   0x8   :  { %s73_s15 = scalar_lea.vmem %s14_s7, 512  ;;  %p78_p4 = scmp.lt.s32.totalorder %s14_s7, %s14_s7 }
   0x9   :  { %p74_p3 = scmp.ne.s32.totalorder %s14_s7, %s73_s15  ;;  %p79_p5 = scmp.lt.s32.totalorder %s73_s15, %s73_s15 }
   0xb   :  { %p80_p6 = por %p79_p5, %p78_p4 }
   0xd   :  { %p81_p7 = pnand %p80_p6, %p74_p3 }
   0xf   :  { %84 = shalt.err (!%p81_p7)
}
  0x10   :  { %s112_s16 = smov 128   ;;  %s113_s17 = smov 8  }
  0x11   :  { %19 = dma.hbm_to_vmem [thread:$0]  %s155_s0, 512, %s14_s7, [#allocation3], %s112_s16, %s112_s16, %s113_s17  }
  0x12   :  { %107 = dma.done.wait [#allocation3], 512  }
  0x13   :  { %108 = vsyncadd [#allocation3], 4294966784  ;;  %v31_v0 = vlaneseq  ;;  %v23_v2 = vld [vmem:[#allocation2] sm:$0xff]  ;;  %v26_v3 = vld [vmem:[#allocation2 + $0x18] sm:$0xff]  ;;  %s114_s20 = smov [#allocation5]  }
  0x14   :  { %v24_v4 = vld [vmem:[#allocation2 + $0x8] sm:$0xff]  ;;  %s47_s21 = sshll.u32 %s114_s20, 4  ;;  %v27_v5 = vrot.slane %v23_v2, 7  ;;  %v30_v6 = vrot.slane %v26_v3, 7  ;;  %v25_v8 = vld [vmem:[#allocation2 + $0x10] sm:$0xff]  ;;  %s48_s21 = int_to_ptr.vmem [resolvable:$true] %s47_s21 }
  0x15   :  { %v32_v1 = vshrl.u32 %v31_v0, 7  ;;  %v28_v7 = vrot.slane %v24_v4, 7  ;;  %v29_v9 = vrot.slane %v25_v8, 7  ;;  %s85_s0 = scalar_lea.vmem %s48_s21, 512  ;;  %p90_p9 = scmp.lt.s32.totalorder %s48_s21, %s48_s21 }
  0x16   :  { %p86_p8 = scmp.ne.s32.totalorder %s48_s21, %s85_s0  ;;  %p91_p10 = scmp.lt.s32.totalorder %s85_s0, %s85_s0 }
  0x17   :  { %vm33_vm0 = vcmp.lt.s32.totalorder %v32_v1, 1 }
  0x18   :  { %v37_v10 = vsel %vm33_vm0, %v30_v6, %v27_v5  ;;  %v36_v11 = vsel %vm33_vm0, %v27_v5, %v28_v7  ;;  %v35_v12 = vsel %vm33_vm0, %v28_v7, %v29_v9  ;;  %v34_v13 = vsel %vm33_vm0, %v29_v9, %v30_v6  ;;  %p92_p11 = por %p91_p10, %p90_p9 }
  0x19   :  { %38 = vst [vmem:[#allocation5] sm:$0xff] %v37_v10  ;;  %39 = vst [vmem:[#allocation5 + $0x8] sm:$0xff] %v36_v11 }
  0x1a   :  { %40 = vst [vmem:[#allocation5 + $0x10] sm:$0xff] %v35_v12  ;;  %41 = vst [vmem:[#allocation5 + $0x18] sm:$0xff] %v34_v13  ;;  %p93_p12 = pnand %p92_p11, %p86_p8 }
  0x1c   :  { %96 = shalt.err (!%p93_p12)
}
  0x1d   :  { %s97_s24 = scalar_lea.hbm %s156_s1, 512 }
  0x1e   :  { %p98_p13 = scmp.ne.s32.totalorder %s156_s1, %s97_s24  ;;  %p101_p0 = scmp.lt.u32.totalorder %s97_s24, %s156_s1 }
  0x20   :  { %p103_p1 = pnand %p101_p0, %p98_p13 }
  0x22   :  { %106 = shalt.err (!%p103_p1)
}
  0x23   :  { %53 = dma.vmem_to_hbm [thread:$0]  %s48_s21, 512, %s156_s1, [#allocation4], %s112_s16, %s112_s16, %s113_s17  }
  0x24   :  { %109 = dma.done.wait [#allocation4], 512  }
  0x25   :  { %110 = vsyncadd [#allocation4], 4294966784 }
  0x26   :  { %57 = vsyncpa [#allocation3], 1 }
  0x27   :  { %58 = vsyncpa [#allocation4], 1 }

</bundles_post_ra>
